<compile_context>
chip_gen: v5e
topology: v5e:2x2
jax: 0.10.0
libtpu: 0.0.40
codegen_flags: <defaults>
</compile_context>

<pallas_src>
import functools
import math

import jax
import jax.numpy as jnp
from jax.experimental import pallas as pl
from jax.experimental.pallas import tpu as pltpu


def _pe_kernel(day_ref, divmask_ref, phase_ref, out_ref, *, n_packed):
    # day_ref:     (T, P) f32 -- P packed positions per output row (pipelined)
    # divmask_ref: (P, W) f32 -- divmask[j, c] = div(c % d_model) if c//d_model==j else 0
    # phase_ref:   (1, W) f32 -- 0 (sin cols) / pi/2 (cos cols), tiled to width W
    # out_ref:     (T, W) f32
    #
    # Lane expansion day(T,P) -> (T,W): P broadcast multiply-adds on the VPU.
    # Exact in f32: every output lane receives exactly one nonzero product.
    angle = day_ref[:, 0:1] * divmask_ref[0:1, :]
    for j in range(1, n_packed):  # static unroll (P is a Python int)
        angle = angle + day_ref[:, j:j + 1] * divmask_ref[j:j + 1, :]
    out_ref[...] = jnp.sin(angle + phase_ref[...])  # one transcendental / element


@functools.partial(jax.jit, static_argnums=(1, 2))
def sinusoidal_positional_encoding(day_indices, d_model, max_len=366):
    """day_indices: integer array of any shape, values in [0, max_len).
    Returns float32 array of shape day_indices.shape + (d_model,)."""
    assert d_model % 2 == 0, "d_model must be even (matches torch slicing)"
    assert max_len < (1 << 24), "positions must stay exactly representable in f32"

    orig_shape = day_indices.shape
    n = math.prod(orig_shape)
    if n == 0:
        return jnp.zeros(orig_shape + (d_model,), jnp.float32)

    # ---- lane-dense packing factor -----------------------------------------
    # Pack P positions per output row so the row width W = P*d_model is a
    # multiple of 128 lanes (unmasked stores, no wasted VPU lanes).  Use the
    # largest divisor of P0 that also divides N so the output never needs a
    # pad + slice copy (P=1 degenerates to the plain (N, d_model) layout).
    p0 = math.lcm(d_model, 128) // d_model
    pack = 1
    p = p0
    while p >= 1:
        if p0 % p == 0 and n % p == 0:
            pack = p
            break
        p -= 1
    w = pack * d_model
    n_rows = n // pack

    days = day_indices.reshape(n).astype(jnp.float32).reshape(n_rows, pack)

    # ---- per-column constants, hoisted out of the kernel (tiny, resident) ---
    half = jnp.exp(
        jnp.arange(0, d_model, 2, dtype=jnp.float32)
        * (-math.log(10000.0) / float(d_model))
    )                                                          # (d_model//2,)
    div_w = jnp.tile(jnp.repeat(half, 2), pack)                # (W,) [d0,d0,d1,d1,...]xP
    phase_w = jnp.tile(
        jnp.array([0.0, math.pi / 2.0], dtype=jnp.float32), w // 2
    ).reshape(1, w)                                            # (1, W) [0,pi/2,...]
    col_grp = jnp.arange(w, dtype=jnp.int32) // d_model        # (W,)
    divmask = jnp.where(
        col_grp[None, :] == jnp.arange(pack, dtype=jnp.int32)[:, None],
        div_w[None, :], 0.0,
    )                                                          # (P, W)

    # ---- byte-based row tiling; budget the lane-padded day buffer -----------
    out_row_bytes = 4 * w
    day_row_bytes = 4 * 128        # (T, P) f32 block is lane-padded to 128 in VMEM
    vmem_budget = 20 * 1024 * 1024  # 2 out + 2 day double-buffers, < 32 MiB scoped
    t_vmem = max(8, vmem_budget // (2 * (out_row_bytes + day_row_bytes)))
    t_target = max(8, (4 * 1024 * 1024) // out_row_bytes)      # ~4 MiB output block
    tile = max(8, (min(t_vmem, t_target) // 8) * 8)
    if tile >= n_rows:
        tile = n_rows  # tiny input: single full-dim block (always a legal block)

    grid = (pl.cdiv(n_rows, tile),)  # ragged last block is masked by Pallas

    cost = pl.CostEstimate(
        flops=int(n) * d_model * (2 * pack + 2),
        transcendentals=int(n) * d_model,
        bytes_accessed=4 * n_rows * pack + 4 * n_rows * w + 4 * (pack + 1) * w,
    )

    out = pl.pallas_call(
        functools.partial(_pe_kernel, n_packed=pack),
        out_shape=jax.ShapeDtypeStruct((n_rows, w), jnp.float32),
        grid=grid,
        in_specs=[
            # packed day positions: tiled per grid step, pipelines with the output
            pl.BlockSpec((tile, pack), lambda i: (i, 0)),
            # div mask / phase rows: tiny, constant index_map -> stay resident
            pl.BlockSpec((pack, w), lambda i: (0, 0)),
            pl.BlockSpec((1, w), lambda i: (0, 0)),
        ],
        out_specs=pl.BlockSpec((tile, w), lambda i: (i, 0)),
        compiler_params=pltpu.CompilerParams(
            # independent row tiles: shard across v7x's 2 TCs (no-op on v5e/v6e)
            dimension_semantics=("parallel",),
            vmem_limit_bytes=32 * 1024 * 1024,
        ),
        cost_estimate=cost,
    )(days, divmask, phase_w)

    # (n_rows, W) -> orig_shape + (d_model,) is row-major consistent: no copy.
    return out.reshape(*orig_shape, d_model)


def _reference(day_indices, d_model, max_len=366):
    # Mirrors the PyTorch module exactly (table build + gather).
    pos = jnp.arange(max_len, dtype=jnp.float32)[:, None]
    div = jnp.exp(
        jnp.arange(0, d_model, 2, dtype=jnp.float32)
        * (-math.log(10000.0) / float(d_model))
    )
    pe = jnp.zeros((max_len, d_model), jnp.float32)
    pe = pe.at[:, 0::2].set(jnp.sin(pos * div))
    pe = pe.at[:, 1::2].set(jnp.cos(pos * div))
    return pe[day_indices]


if __name__ == "__main__":
    key = jax.random.PRNGKey(0)

    # Main case: (B, L) = (2, 8), d_model = 32 -> lane-dense packed path (P=4).
    B, L, d_model, max_len = 2, 8, 32, 366
    day_indices = jax.random.randint(key, (B, L), 0, max_len, dtype=jnp.int32)
    out = sinusoidal_positional_encoding(day_indices, d_model, max_len)
    out = jax.block_until_ready(out)
    ref = _reference(day_indices, d_model, max_len)
    assert out.shape == (B, L, d_model)
    assert out.dtype == jnp.float32
    err = float(jnp.max(jnp.abs(out - ref)))
    # sin(x + pi/2) vs cos(x): <= ~3e-5 worst case at angles ~max_len; 1e-4 is ample.
    assert err < 1e-4, f"packed path mismatch: max abs err {err}"

    # Secondary case: N=15 not divisible by the pack factor -> unpacked fallback.
    day_indices2 = jax.random.randint(key, (3, 5), 0, max_len, dtype=jnp.int32)
    out2 = jax.block_until_ready(
        sinusoidal_positional_encoding(day_indices2, d_model, max_len)
    )
    ref2 = _reference(day_indices2, d_model, max_len)
    err2 = float(jnp.max(jnp.abs(out2 - ref2)))
    assert out2.shape == (3, 5, d_model)
    assert err2 < 1e-4, f"fallback path mismatch: max abs err {err2}"

    print("KERNEL_OK")
</pallas_src>

<mosaic_0001>
module attributes {stable_mosaic.version = 11 : i64} {
  func.func @_pe_kernel(%arg0: i32, %arg1: memref<4x4xf32, #tpu.memory_space<vmem>>, %arg2: memref<4x128xf32, #tpu.memory_space<vmem>>, %arg3: memref<1x128xf32, #tpu.memory_space<vmem>>, %arg4: memref<4x128xf32, #tpu.memory_space<vmem>>) attributes {dimension_semantics = [#tpu.dimension_semantics<parallel>], iteration_bounds = array<i64: 1>, scalar_prefetch = 0 : i64, scratch_operands = 0 : i64, tpu.core_type = #tpu.core_type<tc>, window_params = [{transform_indices = @transform_0, window_bounds = array<i64: 4, 4>}, {pipeline_mode = #tpu.pipeline_mode<synchronous>, transform_indices = @transform_1, window_bounds = array<i64: 4, 128>}, {pipeline_mode = #tpu.pipeline_mode<synchronous>, transform_indices = @transform_2, window_bounds = array<i64: 1, 128>}, {transform_indices = @transform_3, window_bounds = array<i64: 4, 128>}]} {
    %c0 = arith.constant 0 : index
    %c0_0 = arith.constant 0 : index
    %0 = vector.load %arg1[%c0, %c0_0] : memref<4x4xf32, #tpu.memory_space<vmem>>, vector<4x1xf32>
    %c0_1 = arith.constant 0 : index
    %c0_2 = arith.constant 0 : index
    %1 = vector.load %arg2[%c0_1, %c0_2] : memref<4x128xf32, #tpu.memory_space<vmem>>, vector<1x128xf32>
    %2 = vector.broadcast %0 : vector<4x1xf32> to vector<4x128xf32>
    %3 = vector.broadcast %1 : vector<1x128xf32> to vector<4x128xf32>
    %4 = arith.mulf %2, %3 : vector<4x128xf32>
    %c0_3 = arith.constant 0 : index
    %c1 = arith.constant 1 : index
    %5 = vector.load %arg1[%c0_3, %c1] : memref<4x4xf32, #tpu.memory_space<vmem>>, vector<4x1xf32>
    %c1_4 = arith.constant 1 : index
    %c0_5 = arith.constant 0 : index
    %6 = vector.load %arg2[%c1_4, %c0_5] : memref<4x128xf32, #tpu.memory_space<vmem>>, vector<1x128xf32>
    %7 = vector.broadcast %5 : vector<4x1xf32> to vector<4x128xf32>
    %8 = vector.broadcast %6 : vector<1x128xf32> to vector<4x128xf32>
    %9 = arith.mulf %7, %8 : vector<4x128xf32>
    %10 = arith.addf %4, %9 : vector<4x128xf32>
    %c0_6 = arith.constant 0 : index
    %c2 = arith.constant 2 : index
    %11 = vector.load %arg1[%c0_6, %c2] : memref<4x4xf32, #tpu.memory_space<vmem>>, vector<4x1xf32>
    %c2_7 = arith.constant 2 : index
    %c0_8 = arith.constant 0 : index
    %12 = vector.load %arg2[%c2_7, %c0_8] : memref<4x128xf32, #tpu.memory_space<vmem>>, vector<1x128xf32>
    %13 = vector.broadcast %11 : vector<4x1xf32> to vector<4x128xf32>
    %14 = vector.broadcast %12 : vector<1x128xf32> to vector<4x128xf32>
    %15 = arith.mulf %13, %14 : vector<4x128xf32>
    %16 = arith.addf %10, %15 : vector<4x128xf32>
    %c0_9 = arith.constant 0 : index
    %c3 = arith.constant 3 : index
    %17 = vector.load %arg1[%c0_9, %c3] : memref<4x4xf32, #tpu.memory_space<vmem>>, vector<4x1xf32>
    %c3_10 = arith.constant 3 : index
    %c0_11 = arith.constant 0 : index
    %18 = vector.load %arg2[%c3_10, %c0_11] : memref<4x128xf32, #tpu.memory_space<vmem>>, vector<1x128xf32>
    %19 = vector.broadcast %17 : vector<4x1xf32> to vector<4x128xf32>
    %20 = vector.broadcast %18 : vector<1x128xf32> to vector<4x128xf32>
    %21 = arith.mulf %19, %20 : vector<4x128xf32>
    %22 = arith.addf %16, %21 : vector<4x128xf32>
    %c0_12 = arith.constant 0 : index
    %c0_13 = arith.constant 0 : index
    %23 = vector.load %arg3[%c0_12, %c0_13] : memref<1x128xf32, #tpu.memory_space<vmem>>, vector<1x128xf32>
    %24 = vector.broadcast %23 : vector<1x128xf32> to vector<4x128xf32>
    %25 = arith.addf %22, %24 : vector<4x128xf32>
    %26 = math.sin %25 : vector<4x128xf32>
    %c0_14 = arith.constant 0 : index
    %c0_15 = arith.constant 0 : index
    %27 = vector.load %arg4[%c0_14, %c0_15] : memref<4x128xf32, #tpu.memory_space<vmem>>, vector<4x128xf32>
    tpu.vector_store %arg4[%c0_14, %c0_15], %26 {strides = array<i32>} : memref<4x128xf32, #tpu.memory_space<vmem>>, vector<4x128xf32>,
    return
  }
  func.func @transform_0(%arg0: i32) -> (i32, i32) {
    %c0_i32 = arith.constant 0 : i32
    %c0_i32_0 = arith.constant 0 : i32
    return %arg0, %c0_i32 : i32, i32
  }
  func.func @transform_1(%arg0: i32) -> (i32, i32) {
    %c0_i32 = arith.constant 0 : i32
    %c0_i32_0 = arith.constant 0 : i32
    %c0_i32_1 = arith.constant 0 : i32
    return %c0_i32, %c0_i32_0 : i32, i32
  }
  func.func @transform_2(%arg0: i32) -> (i32, i32) {
    %c0_i32 = arith.constant 0 : i32
    %c0_i32_0 = arith.constant 0 : i32
    %c0_i32_1 = arith.constant 0 : i32
    return %c0_i32, %c0_i32_0 : i32, i32
  }
  func.func @transform_3(%arg0: i32) -> (i32, i32) {
    %c0_i32 = arith.constant 0 : i32
    %c0_i32_0 = arith.constant 0 : i32
    return %arg0, %c0_i32 : i32, i32
  }
}

</mosaic_0001>

<bundles_post_ra>
// kernel: tile.13
= control target key start
LH: loop header
LB: loop body
LE: loop exit
PB: predicated region body
PF: predicated region fallthrough
CT: control target
= control target key end

     0   :  { %2 = vsyncpa [#allocation1], 0  ;;  %s69_s8 = smov [#allocation0]   ;;  %s107_s0 = inlined_call_operand.hbm [shape: f32[2], index: 0, kind: input, shape index: {}]   ;;  %s108_s1 = inlined_call_operand.vmem [shape: f32[64,2], index: 1, kind: output, shape index: {}]  }
   0x1   :  { %s8_s0 = sshll.u32 %s107_s0, 4  ;;  %s10_s9 = sshll.u32 %s69_s8, 4  ;;  %s9_s0 = int_to_ptr.hbm [resolvable:$true] %s8_s0  ;;  %s11_s9 = int_to_ptr.vmem [resolvable:$true] %s10_s9 }
   0x2   :  { %13 = dma.hbm_to_vmem [thread:$0]  %s9_s0, 16, %s11_s9, [#allocation1]  }
   0x3   :  { %67 = dma.done.wait [#allocation1], 16  }
   0x4   :  { %68 = vsyncadd [#allocation1], 4294967280  ;;  %v18_v0 = vld [vmem:[#allocation0] ss:$0 sm:$0xff] }
   0x5   :  { %19 = vst [vmem:[%s108_s1] sm:$0xff] %v18_v0 }
   0x6   :  { %35 = vst [vmem:[%s108_s1 + $0x8] sm:$0xff] %v18_v0 }
   0x7   :  { %36 = vst [vmem:[%s108_s1 + $0x10] sm:$0xff] %v18_v0 }
   0x8   :  { %37 = vst [vmem:[%s108_s1 + $0x18] sm:$0xff] %v18_v0 }
   0x9   :  { %38 = vst [vmem:[%s108_s1 + $0x20] sm:$0xff] %v18_v0 }
   0xa   :  { %39 = vst [vmem:[%s108_s1 + $0x28] sm:$0xff] %v18_v0 }
   0xb   :  { %40 = vst [vmem:[%s108_s1 + $0x30] sm:$0xff] %v18_v0 }
   0xc   :  { %41 = vst [vmem:[%s108_s1 + $0x38] sm:$0xff] %v18_v0 }
   0xd   :  { %34 = vsyncpa [#allocation1], 1 }

// kernel: tile.14
= control target key start
LH: loop header
LB: loop body
LE: loop exit
PB: predicated region body
PF: predicated region fallthrough
CT: control target
= control target key end

     0   :  { %s515_s10 = smov 126   ;;  %s516_s11 = smov 122   ;;  %vm3_vm0 = vcmask 15360   ;;  %vm9_vm1 = vcmask 1048560   ;;  %vm15_vm2 = vcmask 1032160   ;;  %vm21_vm3 = vcmask 1015760   ;;  %s783_s0 = inlined_call_operand.vmem [shape: f32[64,2], index: 0, kind: input, shape index: {}]   ;;  %s784_s1 = inlined_call_operand.vmem [shape: f32[1,128], index: 1, kind: output, shape index: {}]  }
   0x1   :  { %v389_v0 = vld [vmem:[%s783_s0 + $0x3f] sm:$0x1]   ;;  %v391_v1 = vld [vmem:[%s783_s0 + $0x3d] sm:$0x1]   ;;  %v393_v2 = vld [vmem:[%s783_s0 + $0x3b] sm:$0x1]  }
   0x2   :  { %7 = vrot.lane.b32.xlu0 %v389_v0, %s515_s10  ;;  %19 = vrot.lane.b32.xlu1 %v391_v1, %s516_s11  ;;  %s517_s14 = smov 118   ;;  %v390_v3 = vld [vmem:[%s783_s0 + $0x3e] sm:$0x1]   ;;  %v392_v4 = vld [vmem:[%s783_s0 + $0x3c] sm:$0x1]   ;;  %s518_s19 = smov 124  }
   0x3   :  { %31 = vrot.lane.b32.xlu2 %v393_v2, %s517_s14  ;;  %s519_s20 = smov 120   ;;  %v394_v5 = vld [vmem:[%s783_s0 + $0x3a] sm:$0x1]   ;;  %s520_s23 = smov 116   ;;  %v395_v6 = vld [vmem:[%s783_s0 + $0x39] sm:$0x1]  }
   0x4   :  { %v396_v7 = vld [vmem:[%s783_s0 + $0x38] sm:$0x1]   ;;  %s521_s28 = smov 114   ;;  %s522_s29 = smov 112   ;;  %v397_v8 = vld [vmem:[%s783_s0 + $0x37] sm:$0x1]  }
   0x5   :  { %s523_s3 = smov 110   ;;  %v398_v9 = vld [vmem:[%s783_s0 + $0x36] sm:$0x1]   ;;  %v399_v10 = vld [vmem:[%s783_s0 + $0x35] sm:$0x1]   ;;  %s524_s8 = smov 108  }
   0x6   :  { %s525_s9 = smov 106   ;;  %v400_v11 = vld [vmem:[%s783_s0 + $0x34] sm:$0x1]   ;;  %s526_s12 = smov 104   ;;  %v401_v12 = vld [vmem:[%s783_s0 + $0x33] sm:$0x1]  }
   0x7   :  { %v402_v13 = vld [vmem:[%s783_s0 + $0x32] sm:$0x1]   ;;  %s527_s17 = smov 102   ;;  %s528_s18 = smov 100   ;;  %v403_v14 = vld [vmem:[%s783_s0 + $0x31] sm:$0x1]  }
   0x8   :  { %s529_s21 = smov 98   ;;  %v404_v15 = vld [vmem:[%s783_s0 + $0x30] sm:$0x1]   ;;  %v405_v16 = vld [vmem:[%s783_s0 + $0x2f] sm:$0x1]   ;;  %s530_s26 = smov 96  }
   0x9   :  { %s531_s27 = smov 94   ;;  %v406_v17 = vld [vmem:[%s783_s0 + $0x2e] sm:$0x1]   ;;  %s532_s30 = smov 92   ;;  %v407_v18 = vld [vmem:[%s783_s0 + $0x2d] sm:$0x1]  }
   0xa   :  { %13 = vrot.lane.b32.xlu0 %v390_v3, %s518_s19  ;;  %25 = vrot.lane.b32.xlu1 %v392_v4, %s519_s20  ;;  %v408_v19 = vld [vmem:[%s783_s0 + $0x2c] sm:$0x1]   ;;  %s533_s6 = smov 90   ;;  %s534_s7 = smov 88   ;;  %v409_v20 = vld [vmem:[%s783_s0 + $0x2b] sm:$0x1]  }
   0xb   :  { %37 = vrot.lane.b32.xlu2 %v394_v5, %s520_s23  ;;  %s535_s10 = smov 86   ;;  %v410_v21 = vld [vmem:[%s783_s0 + $0x2a] sm:$0x1]   ;;  %v411_v22 = vld [vmem:[%s783_s0 + $0x29] sm:$0x1]   ;;  %s536_s15 = smov 84  }
   0xc   :  { %s537_s16 = smov 82   ;;  %v412_v23 = vld [vmem:[%s783_s0 + $0x28] sm:$0x1]   ;;  %s538_s19 = smov 80   ;;  %v413_v24 = vld [vmem:[%s783_s0 + $0x27] sm:$0x1]  }
   0xd   :  { %v414_v25 = vld [vmem:[%s783_s0 + $0x26] sm:$0x1]   ;;  %s539_s24 = smov 78   ;;  %s540_s25 = smov 76   ;;  %v415_v26 = vld [vmem:[%s783_s0 + $0x25] sm:$0x1]  }
   0xe   :  { %v416_v27 = vld [vmem:[%s783_s0 + $0x24] sm:$0x1]   ;;  %v417_v28 = vld [vmem:[%s783_s0 + $0x23] sm:$0x1]   ;;  %s542_s4 = smov 72   ;;  %s543_s5 = smov 70  }
   0xf   :  { %v418_v29 = vld [vmem:[%s783_s0 + $0x22] sm:$0x1]   ;;  %v419_v30 = vld [vmem:[%s783_s0 + $0x21] sm:$0x1]   ;;  %v420_v31 = vld [vmem:[%s783_s0 + $0x20] sm:$0x1]  }
  0x10   :  { %s545_s13 = smov 66   ;;  %s546_s14 = smov 64   ;;  %v421_v32 = vld [vmem:[%s783_s0 + $0x1f] sm:$0x1]   ;;  %v2_v33 = vld [vmem:[%s783_s0] sm:$0x1]  }
  0x11   :  { %4 = vst.msk [vmem:[#allocation0] sm:$0x1] %vm3_vm0, %v2_v33   ;;  %v422_v34 = vld [vmem:[%s783_s0 + $0x1e] sm:$0x1]   ;;  %v423_v35 = vld [vmem:[%s783_s0 + $0x1d] sm:$0x1]  }
  0x12   :  { %43 = vrot.lane.b32.xlu0 %v395_v6, %s521_s28  ;;  %49 = vrot.lane.b32.xlu1 %v396_v7, %s522_s29  ;;  %s541_s28 = smov 74   ;;  %v424_v36 = vld [vmem:[%s783_s0 + $0x1c] sm:$0x1]   ;;  %v425_v37 = vld [vmem:[%s783_s0 + $0x1b] sm:$0x1]   ;;  %s557_s22 = smov 42  }
  0x13   :  { %55 = vrot.lane.b32.xlu2 %v397_v8, %s523_s3  ;;  %v426_v38 = vld [vmem:[%s783_s0 + $0x1a] sm:$0x1]   ;;  %v427_v40 = vld [vmem:[%s783_s0 + $0x19] sm:$0x1]   ;;  %v428_v41 = vld [vmem:[%s783_s0 + $0x18] sm:$0x1]  }
  0x14   :  { %v429_v42 = vld [vmem:[%s783_s0 + $0x17] sm:$0x1]   ;;  %v430_v44 = vld [vmem:[%s783_s0 + $0x16] sm:$0x1]   ;;  %v431_v45 = vld [vmem:[%s783_s0 + $0x15] sm:$0x1]  }
  0x15   :  { %v432_v46 = vld [vmem:[%s783_s0 + $0x14] sm:$0x1]   ;;  %s558_s23 = smov 40   ;;  %v433_v48 = vld [vmem:[%s783_s0 + $0x13] sm:$0x1]   ;;  %s560_s2 = smov 36  }
  0x16   :  { %v434_v51 = vld [vmem:[%s783_s0 + $0x12] sm:$0x1]   ;;  %v435_v52 = vld [vmem:[%s783_s0 + $0x11] sm:$0x1]   ;;  %s561_s3 = smov 34   ;;  %vm27_vm4 = vcmask 999360  }
  0x17   :  { %v436_v54 = vld [vmem:[%s783_s0 + $0x10] sm:$0x1]   ;;  %vm33_vm5 = vcmask 982960   ;;  %vm39_vm6 = vcmask 966560   ;;  %v437_v57 = vld [vmem:[%s783_s0 + $0xf] sm:$0x1]  }
  0x18   :  { %v438_v58 = vld [vmem:[%s783_s0 + $0xe] sm:$0x1]   ;;  %s563_s11 = smov 30   ;;  %vm45_vm7 = vcmask 950160   ;;  %vm51_vm8 = vcmask 933760   ;;  %vm57_vm9 = vcmask 917360  }
  0x19   :  { %v439_v60 = vld [vmem:[%s783_s0 + $0xd] sm:$0x1]   ;;  %v440_v63 = vld [vmem:[%s783_s0 + $0xc] sm:$0x1]   ;;  %v441_v0 = vld [vmem:[%s783_s0 + $0xb] sm:$0x1]  }
  0x1a   :  { %61 = vrot.lane.b32.xlu0 %v398_v9, %s524_s8  ;;  %67 = vrot.lane.b32.xlu1 %v399_v10, %s525_s9  ;;  %s544_s8 = smov 68   ;;  %s566_s20 = smov 24   ;;  %vm63_vm10 = vcmask 900960   ;;  %vm69_vm11 = vcmask 884560   ;;  %v442_v2 = vld [vmem:[%s783_s0 + $0xa] sm:$0x1]  }
  0x1b   :  { %73 = vrot.lane.b32.xlu2 %v400_v11, %s526_s12  ;;  %s564_s12 = smov 28   ;;  %vm75_vm12 = vcmask 868160   ;;  %v443_v5 = vld [vmem:[%s783_s0 + $0x9] sm:$0x1]   ;;  %v444_v6 = vld [vmem:[%s783_s0 + $0x8] sm:$0x1]  }
  0x1c   :  { %s569_s29 = smov 18   ;;  %vm81_vm13 = vcmask 851760   ;;  %vm87_vm14 = vcmask 835360   ;;  %v445_v8 = vld [vmem:[%s783_s0 + $0x7] sm:$0x1]   ;;  %vm93_vm15 = vcmask 818960  }
  0x1d   :  { %v446_v11 = vld [vmem:[%s783_s0 + $0x6] sm:$0x1]   ;;  %s572_s9 = smov 12   ;;  %vm99_vm0 = vcmask 802560  }
  0x22   :  { %79 = vrot.lane.b32.xlu0 %v401_v12, %s527_s17  ;;  %85 = vrot.lane.b32.xlu1 %v402_v13, %s528_s18  ;;  %s556_s17 = smov 44   ;;  %v447_v12 = vld [vmem:[%s783_s0 + $0x5] sm:$0x1]   ;;  %s575_s18 = smov 6  }
  0x23   :  { %91 = vrot.lane.b32.xlu2 %v403_v14, %s529_s21  ;;  %s567_s21 = smov 22   ;;  %v448_v14 = vld [vmem:[%s783_s0 + $0x4] sm:$0x1]  }
  0x2a   :  { %97 = vrot.lane.b32.xlu0 %v404_v15, %s530_s26  ;;  %103 = vrot.lane.b32.xlu1 %v405_v16, %s531_s27  ;;  %s559_s26 = smov 38  }
  0x2b   :  { %109 = vrot.lane.b32.xlu2 %v406_v17, %s532_s30  ;;  %s570_s30 = smov 16   ;;  %v449_v17 = vld [vmem:[%s783_s0 + $0x3] sm:$0x1]  }
  0x32   :  { %115 = vrot.lane.b32.xlu0 %v407_v18, %s533_s6  ;;  %121 = vrot.lane.b32.xlu1 %v408_v19, %s534_s7  ;;  %s562_s6 = smov 32   ;;  %v450_v18 = vld [vmem:[%s783_s0 + $0x2] sm:$0x1]  }
  0x33   :  { %127 = vrot.lane.b32.xlu2 %v409_v20, %s535_s10  ;;  %s573_s10 = smov 10   ;;  %v451_v20 = vld [vmem:[%s783_s0 + $0x1] sm:$0x1]   ;;  %s577_s0 = smov 2  }
  0x3a   :  { %133 = vrot.lane.b32.xlu0 %v410_v21, %s536_s15  ;;  %139 = vrot.lane.b32.xlu1 %v411_v22, %s537_s16  ;;  %s565_s15 = smov 26  }
  0x3b   :  { %145 = vrot.lane.b32.xlu2 %v412_v23, %s538_s19  ;;  %s547_s19 = smov 62  }
  0x42   :  { %151 = vrot.lane.b32.xlu0 %v413_v24, %s539_s24  ;;  %157 = vrot.lane.b32.xlu1 %v414_v25, %s540_s25  ;;  %s548_s24 = smov 60   ;;  %s549_s25 = smov 58  }
  0x43   :  { %163 = vrot.lane.b32.xlu2 %v415_v26, %s541_s28  ;;  %s550_s28 = smov 56  }
  0x4a   :  { %169 = vrot.lane.b32.xlu0 %v416_v27, %s542_s4  ;;  %175 = vrot.lane.b32.xlu1 %v417_v28, %s543_s5  ;;  %s551_s4 = smov 54   ;;  %s552_s5 = smov 52  }
  0x4b   :  { %181 = vrot.lane.b32.xlu2 %v418_v29, %s544_s8  ;;  %s553_s8 = smov 50  }
  0x52   :  { %187 = vrot.lane.b32.xlu0 %v419_v30, %s545_s13  ;;  %193 = vrot.lane.b32.xlu1 %v420_v31, %s546_s14  ;;  %s554_s13 = smov 48   ;;  %s555_s14 = smov 46  }
  0x53   :  { %199 = vrot.lane.b32.xlu2 %v421_v32, %s547_s19  ;;  %s576_s19 = smov 4  }
  0x5a   :  { %205 = vrot.lane.b32.xlu0 %v422_v34, %s548_s24  ;;  %211 = vrot.lane.b32.xlu1 %v423_v35, %s549_s25  ;;  %s568_s24 = smov 20  }
  0x5b   :  { %217 = vrot.lane.b32.xlu2 %v424_v36, %s550_s28 }
  0x5d   :  { %v32_v39 = vpop.permute.xlu2 %31  }
  0x62   :  { %223 = vrot.lane.b32.xlu0 %v425_v37, %s551_s4  ;;  %229 = vrot.lane.b32.xlu1 %v426_v38, %s552_s5  ;;  %s571_s4 = smov 14  }
  0x63   :  { %235 = vrot.lane.b32.xlu2 %v427_v40, %s553_s8 }
  0x65   :  { %v38_v43 = vpop.permute.xlu2 %37  }
  0x6a   :  { %241 = vrot.lane.b32.xlu0 %v428_v41, %s554_s13  ;;  %247 = vrot.lane.b32.xlu1 %v429_v42, %s555_s14  ;;  %s574_s13 = smov 8  }
  0x6b   :  { %253 = vrot.lane.b32.xlu2 %v430_v44, %s556_s17 }
  0x6d   :  { %v56_v47 = vpop.permute.xlu2 %55  }
  0x72   :  { %259 = vrot.lane.b32.xlu0 %v431_v45, %s557_s22  ;;  %265 = vrot.lane.b32.xlu1 %v432_v46, %s558_s23 }
  0x73   :  { %271 = vrot.lane.b32.xlu2 %v433_v48, %s559_s26 }
  0x74   :  { %v8_v49 = vpop.permute.xlu0 %7   ;;  %v20_v50 = vpop.permute.xlu1 %19  }
  0x75   :  { %10 = vst.msk [vmem:[#allocation0] sm:$0x1] %vm9_vm1, %v8_v49   ;;  %v74_v53 = vpop.permute.xlu2 %73   ;;  %vm105_vm1 = vcmask 786160  }
  0x7a   :  { %277 = vrot.lane.b32.xlu0 %v434_v51, %s560_s2  ;;  %283 = vrot.lane.b32.xlu1 %v435_v52, %s561_s3 }
  0x7b   :  { %289 = vrot.lane.b32.xlu2 %v436_v54, %s562_s6 }
  0x7c   :  { %v14_v55 = vpop.permute.xlu0 %13   ;;  %v26_v56 = vpop.permute.xlu1 %25  }
  0x7d   :  { %16 = vst.msk [vmem:[#allocation0] sm:$0x1] %vm15_vm2, %v14_v55   ;;  %v92_v59 = vpop.permute.xlu2 %91   ;;  %vm111_vm2 = vcmask 769760  }
  0x7e   :  { %22 = vst.msk [vmem:[#allocation0] sm:$0x1] %vm21_vm3, %v20_v50   ;;  %vm117_vm3 = vcmask 753360  }
  0x7f   :  { %28 = vst.msk [vmem:[#allocation0] sm:$0x1] %vm27_vm4, %v26_v56   ;;  %vm123_vm4 = vcmask 736960  }
  0x80   :  { %34 = vst.msk [vmem:[#allocation0] sm:$0x1] %vm33_vm5, %v32_v39   ;;  %vm129_vm5 = vcmask 720560  }
  0x81   :  { %40 = vst.msk [vmem:[#allocation0] sm:$0x1] %vm39_vm6, %v38_v43   ;;  %vm135_vm6 = vcmask 704160  }
  0x82   :  { %295 = vrot.lane.b32.xlu0 %v437_v57, %s563_s11  ;;  %301 = vrot.lane.b32.xlu1 %v438_v58, %s564_s12 }
  0x83   :  { %307 = vrot.lane.b32.xlu2 %v439_v60, %s565_s15 }
  0x84   :  { %v44_v61 = vpop.permute.xlu0 %43   ;;  %v50_v62 = vpop.permute.xlu1 %49  }
  0x85   :  { %46 = vst.msk [vmem:[#allocation0] sm:$0x1] %vm45_vm7, %v44_v61   ;;  %v110_v1 = vpop.permute.xlu2 %109   ;;  %vm141_vm7 = vcmask 687760  }
  0x86   :  { %52 = vst.msk [vmem:[#allocation0] sm:$0x1] %vm51_vm8, %v50_v62   ;;  %vm147_vm8 = vcmask 671360  }
  0x87   :  { %58 = vst.msk [vmem:[#allocation0] sm:$0x1] %vm57_vm9, %v56_v47   ;;  %vm153_vm9 = vcmask 654960  }
  0x8a   :  { %313 = vrot.lane.b32.xlu0 %v440_v63, %s566_s20  ;;  %319 = vrot.lane.b32.xlu1 %v441_v0, %s567_s21 }
  0x8b   :  { %325 = vrot.lane.b32.xlu2 %v442_v2, %s568_s24 }
  0x8c   :  { %v62_v3 = vpop.permute.xlu0 %61   ;;  %v68_v4 = vpop.permute.xlu1 %67  }
  0x8d   :  { %64 = vst.msk [vmem:[#allocation0] sm:$0x1] %vm63_vm10, %v62_v3   ;;  %v128_v7 = vpop.permute.xlu2 %127   ;;  %vm159_vm10 = vcmask 638560  }
  0x8e   :  { %70 = vst.msk [vmem:[#allocation0] sm:$0x1] %vm69_vm11, %v68_v4   ;;  %vm165_vm11 = vcmask 622160  }
  0x8f   :  { %76 = vst.msk [vmem:[#allocation0] sm:$0x1] %vm75_vm12, %v74_v53   ;;  %vm171_vm12 = vcmask 605760  }
  0x92   :  { %331 = vrot.lane.b32.xlu0 %v443_v5, %s569_s29  ;;  %337 = vrot.lane.b32.xlu1 %v444_v6, %s570_s30 }
  0x93   :  { %343 = vrot.lane.b32.xlu2 %v445_v8, %s571_s4 }
  0x94   :  { %v80_v9 = vpop.permute.xlu0 %79   ;;  %v86_v10 = vpop.permute.xlu1 %85  }
  0x95   :  { %82 = vst.msk [vmem:[#allocation0] sm:$0x1] %vm81_vm13, %v80_v9   ;;  %v146_v13 = vpop.permute.xlu2 %145   ;;  %vm177_vm13 = vcmask 589360  }
  0x96   :  { %88 = vst.msk [vmem:[#allocation0] sm:$0x1] %vm87_vm14, %v86_v10   ;;  %vm183_vm14 = vcmask 572960  }
  0x97   :  { %94 = vst.msk [vmem:[#allocation0] sm:$0x1] %vm93_vm15, %v92_v59   ;;  %vm189_vm15 = vcmask 556560  }
  0x9a   :  { %349 = vrot.lane.b32.xlu0 %v446_v11, %s572_s9  ;;  %355 = vrot.lane.b32.xlu1 %v447_v12, %s573_s10 }
  0x9b   :  { %361 = vrot.lane.b32.xlu2 %v448_v14, %s574_s13 }
  0x9c   :  { %v98_v15 = vpop.permute.xlu0 %97   ;;  %v104_v16 = vpop.permute.xlu1 %103  }
  0x9d   :  { %100 = vst.msk [vmem:[#allocation0] sm:$0x1] %vm99_vm0, %v98_v15   ;;  %v164_v19 = vpop.permute.xlu2 %163   ;;  %vm195_vm0 = vcmask 540160  }
  0x9e   :  { %106 = vst.msk [vmem:[#allocation0] sm:$0x1] %vm105_vm1, %v104_v16   ;;  %vm201_vm1 = vcmask 523760  }
  0x9f   :  { %112 = vst.msk [vmem:[#allocation0] sm:$0x1] %vm111_vm2, %v110_v1   ;;  %vm207_vm2 = vcmask 507360  }
  0xa2   :  { %367 = vrot.lane.b32.xlu0 %v449_v17, %s575_s18  ;;  %373 = vrot.lane.b32.xlu1 %v450_v18, %s576_s19 }
  0xa3   :  { %379 = vrot.lane.b32.xlu2 %v451_v20, %s577_s0 }
  0xa4   :  { %v116_v21 = vpop.permute.xlu0 %115   ;;  %v122_v22 = vpop.permute.xlu1 %121  }
  0xa5   :  { %118 = vst.msk [vmem:[#allocation0] sm:$0x1] %vm117_vm3, %v116_v21   ;;  %v182_v23 = vpop.permute.xlu2 %181   ;;  %vm213_vm3 = vcmask 490960  }
  0xa6   :  { %124 = vst.msk [vmem:[#allocation0] sm:$0x1] %vm123_vm4, %v122_v22   ;;  %vm219_vm4 = vcmask 474560  }
  0xa7   :  { %130 = vst.msk [vmem:[#allocation0] sm:$0x1] %vm129_vm5, %v128_v7   ;;  %vm225_vm5 = vcmask 458160  }
  0xac   :  { %v134_v24 = vpop.permute.xlu0 %133   ;;  %v140_v25 = vpop.permute.xlu1 %139  }
  0xad   :  { %136 = vst.msk [vmem:[#allocation0] sm:$0x1] %vm135_vm6, %v134_v24   ;;  %v200_v26 = vpop.permute.xlu2 %199   ;;  %vm231_vm6 = vcmask 441760  }
  0xae   :  { %142 = vst.msk [vmem:[#allocation0] sm:$0x1] %vm141_vm7, %v140_v25   ;;  %vm237_vm7 = vcmask 425360  }
  0xaf   :  { %148 = vst.msk [vmem:[#allocation0] sm:$0x1] %vm147_vm8, %v146_v13   ;;  %vm243_vm8 = vcmask 408960  }
  0xb4   :  { %v152_v27 = vpop.permute.xlu0 %151   ;;  %v158_v28 = vpop.permute.xlu1 %157  }
  0xb5   :  { %154 = vst.msk [vmem:[#allocation0] sm:$0x1] %vm153_vm9, %v152_v27   ;;  %v218_v29 = vpop.permute.xlu2 %217   ;;  %vm249_vm9 = vcmask 392560  }
  0xb6   :  { %160 = vst.msk [vmem:[#allocation0] sm:$0x1] %vm159_vm10, %v158_v28   ;;  %vm255_vm10 = vcmask 376160  }
  0xb7   :  { %166 = vst.msk [vmem:[#allocation0] sm:$0x1] %vm165_vm11, %v164_v19   ;;  %vm261_vm11 = vcmask 359760  }
  0xbc   :  { %v170_v30 = vpop.permute.xlu0 %169   ;;  %v176_v31 = vpop.permute.xlu1 %175  }
  0xbd   :  { %172 = vst.msk [vmem:[#allocation0] sm:$0x1] %vm171_vm12, %v170_v30   ;;  %v236_v32 = vpop.permute.xlu2 %235   ;;  %vm267_vm12 = vcmask 343360  }
  0xbe   :  { %178 = vst.msk [vmem:[#allocation0] sm:$0x1] %vm177_vm13, %v176_v31   ;;  %vm273_vm13 = vcmask 326960  }
  0xbf   :  { %184 = vst.msk [vmem:[#allocation0] sm:$0x1] %vm183_vm14, %v182_v23   ;;  %vm279_vm14 = vcmask 310560  }
  0xc4   :  { %v188_v33 = vpop.permute.xlu0 %187   ;;  %v194_v34 = vpop.permute.xlu1 %193  }
  0xc5   :  { %190 = vst.msk [vmem:[#allocation0] sm:$0x1] %vm189_vm15, %v188_v33   ;;  %v254_v35 = vpop.permute.xlu2 %253   ;;  %vm285_vm15 = vcmask 294160  }
  0xc6   :  { %196 = vst.msk [vmem:[#allocation0] sm:$0x1] %vm195_vm0, %v194_v34   ;;  %vm291_vm0 = vcmask 277760  }
  0xc7   :  { %202 = vst.msk [vmem:[#allocation0] sm:$0x1] %vm201_vm1, %v200_v26   ;;  %vm297_vm1 = vcmask 261360  }
  0xcc   :  { %v206_v36 = vpop.permute.xlu0 %205   ;;  %v212_v37 = vpop.permute.xlu1 %211  }
  0xcd   :  { %208 = vst.msk [vmem:[#allocation0] sm:$0x1] %vm207_vm2, %v206_v36   ;;  %v272_v38 = vpop.permute.xlu2 %271   ;;  %vm303_vm2 = vcmask 244960  }
  0xce   :  { %214 = vst.msk [vmem:[#allocation0] sm:$0x1] %vm213_vm3, %v212_v37   ;;  %vm309_vm3 = vcmask 228560  }
  0xcf   :  { %220 = vst.msk [vmem:[#allocation0] sm:$0x1] %vm219_vm4, %v218_v29   ;;  %vm315_vm4 = vcmask 212160  }
  0xd4   :  { %v224_v39 = vpop.permute.xlu0 %223   ;;  %v230_v40 = vpop.permute.xlu1 %229  }
  0xd5   :  { %226 = vst.msk [vmem:[#allocation0] sm:$0x1] %vm225_vm5, %v224_v39   ;;  %v290_v41 = vpop.permute.xlu2 %289   ;;  %vm321_vm5 = vcmask 195760  }
  0xd6   :  { %232 = vst.msk [vmem:[#allocation0] sm:$0x1] %vm231_vm6, %v230_v40   ;;  %vm327_vm6 = vcmask 179360  }
  0xd7   :  { %238 = vst.msk [vmem:[#allocation0] sm:$0x1] %vm237_vm7, %v236_v32   ;;  %vm333_vm7 = vcmask 162960  }
  0xdc   :  { %v242_v42 = vpop.permute.xlu0 %241   ;;  %v248_v43 = vpop.permute.xlu1 %247  }
  0xdd   :  { %244 = vst.msk [vmem:[#allocation0] sm:$0x1] %vm243_vm8, %v242_v42   ;;  %v308_v44 = vpop.permute.xlu2 %307   ;;  %vm339_vm8 = vcmask 146560  }
  0xde   :  { %250 = vst.msk [vmem:[#allocation0] sm:$0x1] %vm249_vm9, %v248_v43   ;;  %vm345_vm9 = vcmask 130160  }
  0xdf   :  { %256 = vst.msk [vmem:[#allocation0] sm:$0x1] %vm255_vm10, %v254_v35   ;;  %vm351_vm10 = vcmask 113760  }
  0xe4   :  { %v260_v45 = vpop.permute.xlu0 %259   ;;  %v266_v46 = vpop.permute.xlu1 %265  }
  0xe5   :  { %262 = vst.msk [vmem:[#allocation0] sm:$0x1] %vm261_vm11, %v260_v45   ;;  %v326_v47 = vpop.permute.xlu2 %325   ;;  %vm357_vm11 = vcmask 97360  }
  0xe6   :  { %268 = vst.msk [vmem:[#allocation0] sm:$0x1] %vm267_vm12, %v266_v46   ;;  %vm363_vm12 = vcmask 80960  }
  0xe7   :  { %274 = vst.msk [vmem:[#allocation0] sm:$0x1] %vm273_vm13, %v272_v38   ;;  %vm369_vm13 = vcmask 64560  }
  0xec   :  { %v278_v48 = vpop.permute.xlu0 %277   ;;  %v284_v49 = vpop.permute.xlu1 %283  }
  0xed   :  { %280 = vst.msk [vmem:[#allocation0] sm:$0x1] %vm279_vm14, %v278_v48   ;;  %v344_v50 = vpop.permute.xlu2 %343   ;;  %vm375_vm14 = vcmask 48160  }
  0xee   :  { %286 = vst.msk [vmem:[#allocation0] sm:$0x1] %vm285_vm15, %v284_v49   ;;  %vm381_vm15 = vcmask 31760  }
  0xef   :  { %292 = vst.msk [vmem:[#allocation0] sm:$0x1] %vm291_vm0, %v290_v41  }
  0xf4   :  { %v296_v51 = vpop.permute.xlu0 %295   ;;  %v302_v52 = vpop.permute.xlu1 %301  }
  0xf5   :  { %298 = vst.msk [vmem:[#allocation0] sm:$0x1] %vm297_vm1, %v296_v51   ;;  %v362_v53 = vpop.permute.xlu2 %361  }
  0xf6   :  { %304 = vst.msk [vmem:[#allocation0] sm:$0x1] %vm303_vm2, %v302_v52  }
  0xf7   :  { %310 = vst.msk [vmem:[#allocation0] sm:$0x1] %vm309_vm3, %v308_v44  }
  0xfc   :  { %v314_v54 = vpop.permute.xlu0 %313   ;;  %v320_v55 = vpop.permute.xlu1 %319  }
  0xfd   :  { %316 = vst.msk [vmem:[#allocation0] sm:$0x1] %vm315_vm4, %v314_v54   ;;  %v380_v56 = vpop.permute.xlu2 %379  }
  0xfe   :  { %322 = vst.msk [vmem:[#allocation0] sm:$0x1] %vm321_vm5, %v320_v55  }
  0xff   :  { %328 = vst.msk [vmem:[#allocation0] sm:$0x1] %vm327_vm6, %v326_v47  }
 0x104   :  { %v332_v57 = vpop.permute.xlu0 %331   ;;  %v338_v58 = vpop.permute.xlu1 %337  }
 0x105   :  { %334 = vst.msk [vmem:[#allocation0] sm:$0x1] %vm333_vm7, %v332_v57  }
 0x106   :  { %340 = vst.msk [vmem:[#allocation0] sm:$0x1] %vm339_vm8, %v338_v58  }
 0x107   :  { %346 = vst.msk [vmem:[#allocation0] sm:$0x1] %vm345_vm9, %v344_v50  }
 0x10c   :  { %v350_v59 = vpop.permute.xlu0 %349   ;;  %v356_v60 = vpop.permute.xlu1 %355  }
 0x10d   :  { %352 = vst.msk [vmem:[#allocation0] sm:$0x1] %vm351_vm10, %v350_v59  }
 0x10e   :  { %358 = vst.msk [vmem:[#allocation0] sm:$0x1] %vm357_vm11, %v356_v60  }
 0x10f   :  { %364 = vst.msk [vmem:[#allocation0] sm:$0x1] %vm363_vm12, %v362_v53  }
 0x114   :  { %v368_v61 = vpop.permute.xlu0 %367   ;;  %v374_v62 = vpop.permute.xlu1 %373  }
 0x115   :  { %370 = vst.msk [vmem:[#allocation0] sm:$0x1] %vm369_vm13, %v368_v61  }
 0x116   :  { %376 = vst.msk [vmem:[#allocation0] sm:$0x1] %vm375_vm14, %v374_v62  }
 0x117   :  { %382 = vst.msk [vmem:[#allocation0] sm:$0x1] %vm381_vm15, %v380_v56  }
 0x11e   :  { %v385_v63 = vld [vmem:[#allocation0] sm:$0x1] }
 0x11f   :  { %388 = vst [vmem:[%s784_s1] sm:$0x1] %v385_v63 }

// kernel: tile.10
= control target key start
LH: loop header
LB: loop body
LE: loop exit
PB: predicated region body
PF: predicated region fallthrough
CT: control target
= control target key end

     0   :  { %s22_s0 = inlined_call_operand.vmem [shape: f32[32], index: 0, kind: input, shape index: {}]   ;;  %s23_s1 = inlined_call_operand.vmem [shape: f32[4,32], index: 1, kind: output, shape index: {}]  }
   0x1   :  { %v4_v0 = vld [vmem:[%s22_s0] ss:$0 sm:$0xff] }
   0x2   :  { %5 = vst [vmem:[%s23_s1] sm:$0xf] %v4_v0 }

// kernel: tile.9
= control target key start
LH: loop header
LB: loop body
LE: loop exit
PB: predicated region body
PF: predicated region fallthrough
CT: control target
= control target key end

     0   :  { %s131_s10 = smov 30   ;;  %s132_s11 = smov 26   ;;  %vm3_vm0 = vcmask 15360   ;;  %vm9_vm1 = vcmask 261360   ;;  %vm15_vm2 = vcmask 244960   ;;  %vm21_vm3 = vcmask 228560   ;;  %s207_s0 = inlined_call_operand.vmem [shape: f32[16,2], index: 0, kind: input, shape index: {}]   ;;  %s208_s1 = inlined_call_operand.vmem [shape: f32[32], index: 1, kind: output, shape index: {}]  }
   0x1   :  { %v101_v0 = vld [vmem:[%s207_s0 + $0xf] sm:$0x1]   ;;  %v103_v1 = vld [vmem:[%s207_s0 + $0xd] sm:$0x1]   ;;  %v105_v2 = vld [vmem:[%s207_s0 + $0xb] sm:$0x1]  }
   0x2   :  { %7 = vrot.lane.b32.xlu0 %v101_v0, %s131_s10  ;;  %19 = vrot.lane.b32.xlu1 %v103_v1, %s132_s11  ;;  %s133_s14 = smov 22   ;;  %v102_v3 = vld [vmem:[%s207_s0 + $0xe] sm:$0x1]   ;;  %v104_v4 = vld [vmem:[%s207_s0 + $0xc] sm:$0x1]   ;;  %s134_s19 = smov 28  }
   0x3   :  { %31 = vrot.lane.b32.xlu2 %v105_v2, %s133_s14  ;;  %s135_s20 = smov 24   ;;  %v106_v5 = vld [vmem:[%s207_s0 + $0xa] sm:$0x1]   ;;  %s136_s23 = smov 20   ;;  %v107_v6 = vld [vmem:[%s207_s0 + $0x9] sm:$0x1]  }
   0x4   :  { %v108_v7 = vld [vmem:[%s207_s0 + $0x8] sm:$0x1]   ;;  %s137_s28 = smov 18   ;;  %s138_s29 = smov 16   ;;  %v109_v8 = vld [vmem:[%s207_s0 + $0x7] sm:$0x1]  }
   0x5   :  { %s139_s3 = smov 14   ;;  %v110_v9 = vld [vmem:[%s207_s0 + $0x6] sm:$0x1]   ;;  %v111_v10 = vld [vmem:[%s207_s0 + $0x5] sm:$0x1]   ;;  %s140_s8 = smov 12  }
   0x6   :  { %s141_s9 = smov 10   ;;  %v112_v11 = vld [vmem:[%s207_s0 + $0x4] sm:$0x1]   ;;  %s142_s12 = smov 8   ;;  %v113_v12 = vld [vmem:[%s207_s0 + $0x3] sm:$0x1]  }
   0x7   :  { %v114_v13 = vld [vmem:[%s207_s0 + $0x2] sm:$0x1]   ;;  %s143_s17 = smov 6   ;;  %s144_s18 = smov 4   ;;  %v115_v14 = vld [vmem:[%s207_s0 + $0x1] sm:$0x1]  }
   0x8   :  { %s145_s21 = smov 2   ;;  %v2_v15 = vld [vmem:[%s207_s0] sm:$0x1]   ;;  %vm27_vm4 = vcmask 212160   ;;  %vm33_vm5 = vcmask 195760   ;;  %vm39_vm6 = vcmask 179360  }
   0x9   :  { %4 = vst.msk [vmem:[#allocation0] sm:$0x1] %vm3_vm0, %v2_v15   ;;  %vm45_vm7 = vcmask 162960   ;;  %vm51_vm8 = vcmask 146560   ;;  %vm57_vm9 = vcmask 130160   ;;  %vm63_vm10 = vcmask 113760  }
   0xa   :  { %13 = vrot.lane.b32.xlu0 %v102_v3, %s134_s19  ;;  %25 = vrot.lane.b32.xlu1 %v104_v4, %s135_s20  ;;  %vm69_vm11 = vcmask 97360   ;;  %vm75_vm12 = vcmask 80960   ;;  %vm81_vm13 = vcmask 64560   ;;  %vm87_vm14 = vcmask 48160  }
   0xb   :  { %37 = vrot.lane.b32.xlu2 %v106_v5, %s136_s23  ;;  %vm93_vm15 = vcmask 31760  }
  0x12   :  { %43 = vrot.lane.b32.xlu0 %v107_v6, %s137_s28  ;;  %49 = vrot.lane.b32.xlu1 %v108_v7, %s138_s29 }
  0x13   :  { %55 = vrot.lane.b32.xlu2 %v109_v8, %s139_s3 }
  0x1a   :  { %61 = vrot.lane.b32.xlu0 %v110_v9, %s140_s8  ;;  %67 = vrot.lane.b32.xlu1 %v111_v10, %s141_s9 }
  0x1b   :  { %73 = vrot.lane.b32.xlu2 %v112_v11, %s142_s12 }
  0x22   :  { %79 = vrot.lane.b32.xlu0 %v113_v12, %s143_s17  ;;  %85 = vrot.lane.b32.xlu1 %v114_v13, %s144_s18 }
  0x23   :  { %91 = vrot.lane.b32.xlu2 %v115_v14, %s145_s21 }
  0x5d   :  { %v32_v16 = vpop.permute.xlu2 %31  }
  0x65   :  { %v38_v17 = vpop.permute.xlu2 %37  }
  0x6d   :  { %v56_v18 = vpop.permute.xlu2 %55  }
  0x74   :  { %v8_v19 = vpop.permute.xlu0 %7   ;;  %v20_v20 = vpop.permute.xlu1 %19  }
  0x75   :  { %10 = vst.msk [vmem:[#allocation0] sm:$0x1] %vm9_vm1, %v8_v19   ;;  %v74_v21 = vpop.permute.xlu2 %73  }
  0x7c   :  { %v14_v22 = vpop.permute.xlu0 %13   ;;  %v26_v23 = vpop.permute.xlu1 %25  }
  0x7d   :  { %16 = vst.msk [vmem:[#allocation0] sm:$0x1] %vm15_vm2, %v14_v22   ;;  %v92_v24 = vpop.permute.xlu2 %91  }
  0x7e   :  { %22 = vst.msk [vmem:[#allocation0] sm:$0x1] %vm21_vm3, %v20_v20  }
  0x7f   :  { %28 = vst.msk [vmem:[#allocation0] sm:$0x1] %vm27_vm4, %v26_v23  }
  0x80   :  { %34 = vst.msk [vmem:[#allocation0] sm:$0x1] %vm33_vm5, %v32_v16  }
  0x81   :  { %40 = vst.msk [vmem:[#allocation0] sm:$0x1] %vm39_vm6, %v38_v17  }
  0x84   :  { %v44_v25 = vpop.permute.xlu0 %43   ;;  %v50_v26 = vpop.permute.xlu1 %49  }
  0x85   :  { %46 = vst.msk [vmem:[#allocation0] sm:$0x1] %vm45_vm7, %v44_v25  }
  0x86   :  { %52 = vst.msk [vmem:[#allocation0] sm:$0x1] %vm51_vm8, %v50_v26  }
  0x87   :  { %58 = vst.msk [vmem:[#allocation0] sm:$0x1] %vm57_vm9, %v56_v18  }
  0x8c   :  { %v62_v27 = vpop.permute.xlu0 %61   ;;  %v68_v28 = vpop.permute.xlu1 %67  }
  0x8d   :  { %64 = vst.msk [vmem:[#allocation0] sm:$0x1] %vm63_vm10, %v62_v27  }
  0x8e   :  { %70 = vst.msk [vmem:[#allocation0] sm:$0x1] %vm69_vm11, %v68_v28  }
  0x8f   :  { %76 = vst.msk [vmem:[#allocation0] sm:$0x1] %vm75_vm12, %v74_v21  }
  0x94   :  { %v80_v29 = vpop.permute.xlu0 %79   ;;  %v86_v30 = vpop.permute.xlu1 %85  }
  0x95   :  { %82 = vst.msk [vmem:[#allocation0] sm:$0x1] %vm81_vm13, %v80_v29  }
  0x96   :  { %88 = vst.msk [vmem:[#allocation0] sm:$0x1] %vm87_vm14, %v86_v30  }
  0x97   :  { %94 = vst.msk [vmem:[#allocation0] sm:$0x1] %vm93_vm15, %v92_v24  }
  0x9e   :  { %v97_v31 = vld [vmem:[#allocation0] sm:$0x1] }
  0x9f   :  { %100 = vst [vmem:[%s208_s1] sm:$0x1] %v97_v31 }

// kernel: sinusoidal_positional_encoding.1
= control target key start
LH: loop header
LB: loop body
LE: loop exit
PB: predicated region body
PF: predicated region fallthrough
CT: control target
= control target key end

     0   :  { %v235_v0 = vmov 0   ;;  %v236_v2 = vmov 2   ;;  %v237_v3 = vmov 1   ;;  %v238_v4 = vmov 3   ;;  %s347_s0 = inlined_call_operand.vmem [shape: f32[4,4], index: 0, kind: input, shape index: {}]   ;;  %s348_s1 = inlined_call_operand.vmem [shape: f32[4,128], index: 1, kind: input, shape index: {}]   ;;  %s349_s2 = inlined_call_operand.vmem [shape: f32[1,128], index: 2, kind: input, shape index: {}]   ;;  %s350_s3 = inlined_call_operand.vmem [shape: f32[4,128], index: 3, kind: output, shape index: {}]  }
   0x1   :  { %225 = vset.pattern.permute.xlu0 %v235_v0  ;;  %v14_v1 = vld [vmem:[%s347_s0] sm:$0xf]  ;;  %227 = vset.pattern.permute.xlu1 %v236_v2  ;;  %v239_v33 = vmov 683565275   ;;  %v240_v35 = vmov 2475754826  }
   0x2   :  { %18 = vperm.xlu0 %225, %v14_v1   ;;  %33 = vperm.xlu1 %227, %v14_v1   ;;  %v230_v7 = vld [vmem:[%s348_s1] ss:$0 sm:$0xff]  ;;  %v232_v8 = vld [vmem:[%s348_s1 + $0x1] ss:$0 sm:$0xff]  ;;  %v231_v9 = vld [vmem:[%s348_s1 + $0x2] ss:$0 sm:$0xff] }
   0x3   :  { %v233_v10 = vld [vmem:[%s348_s1 + $0x3] ss:$0 sm:$0xff]  ;;  %v234_v18 = vld [vmem:[%s349_s2] ss:$0 sm:$0xff]  ;;  %v241_v38 = vmov 2131351028  }
   0x4   :  { %v242_v41 = vmov 2102212464   ;;  %v243_v44 = vmov 920167782   ;;  %v244_v47 = vmov 1326507024  }
   0xa   :  { %226 = vset.pattern.permute.xlu0 %v237_v3  ;;  %228 = vset.pattern.permute.xlu1 %v238_v4 }
   0xb   :  { %25 = vperm.xlu0 %226, %v14_v1   ;;  %41 = vperm.xlu1 %228, %v14_v1  }
  0x13   :  { %229 = vset.pattern.permute.xlu0 %v238_v4 }
  0x74   :  { %v19_v5 = vpop.permute.xlu0 %18  ;;  %v34_v6 = vpop.permute.xlu1 %33 }
  0x75   :  { %v22_v13 = vmul.f32 %v230_v7, %v19_v5  ;;  %v37_v15 = vmul.f32 %v231_v9, %v34_v6 }
  0x7d   :  { %v26_v11 = vpop.permute.xlu0 %25  ;;  %v42_v12 = vpop.permute.xlu1 %41 }
  0x7e   :  { %v29_v14 = vmul.f32 %v232_v8, %v26_v11  ;;  %v45_v17 = vmul.f32 %v233_v10, %v42_v12 }
  0x80   :  { %v30_v16 = vadd.f32 %v29_v14, %v22_v13 }
  0x82   :  { %v38_v19 = vadd.f32 %v37_v15, %v30_v16 }
  0x84   :  { %v46_v20 = vadd.f32 %v45_v17, %v38_v19 }
  0x86   :  { %v284_v21 = vadd.f32 %v234_v18, %v46_v20 }
  0x88   :  { %v55_v22 = vand.u32 2139095040, %v284_v21  ;;  %v52_v25 = vand.u32 2147483647, %v284_v21  ;;  %vm54_vm12 = vcmp.lt.s32.totalorder %v284_v21, 0 }
  0x8a   :  { %v56_v23 = vshrl.u32 %v55_v22, 23  ;;  %v59_v27 = vand.u32 8388607, %v52_v25  ;;  %vm53_vm13 = vcmp.le.f32.partialorder %v52_v25, 0.7853982 }
  0x8c   :  { %v212_v24 = vadd.s32 4294967169, %v56_v23  ;;  %v60_v31 = vor.u32 8388608, %v59_v27 }
  0x8e   :  { %v62_v26 = vadd.s32 1, %v212_v24  ;;  %v301_v54 = vshll.u32 %v60_v31, 8 }
  0x90   :  { %vm63_vm0 = vcmp.gt.s32.totalorder %v62_v26, 0  ;;  %v101_v63 = vand.u32 65535, %v301_v54  ;;  %v102_v1 = vshrl.u32 %v301_v54, 16 }
  0x91   :  { %v64_v28 = vsel %vm63_vm0, %v62_v26, 0 }
  0x92   :  { %v66_v29 = vand.u32 31, %v64_v28  ;;  %v292_v32 = vshrl.u32 %v64_v28, 5 }
  0x94   :  { %v290_v30 = vsub.s32 32, %v66_v29  ;;  %v69_v34 = vshll.u32 %v239_v33, %v66_v29  ;;  %v72_v36 = vshll.u32 %v240_v35, %v66_v29  ;;  %v75_v40 = vshll.u32 %v241_v38, %v66_v29 }
  0x95   :  { %v78_v43 = vshll.u32 %v242_v41, %v66_v29  ;;  %v81_v46 = vshll.u32 %v243_v44, %v66_v29  ;;  %vm84_vm1 = vcmp.lt.s32.totalorder %v292_v32, 1  ;;  %vm87_vm2 = vcmp.lt.s32.totalorder %v292_v32, 4 }
  0x96   :  { %v70_v37 = vshrl.u32 %v240_v35, %v290_v30  ;;  %v73_v39 = vshrl.u32 %v241_v38, %v290_v30  ;;  %v76_v42 = vshrl.u32 %v242_v41, %v290_v30  ;;  %v79_v45 = vshrl.u32 %v243_v44, %v290_v30 }
  0x97   :  { %v82_v48 = vshrl.u32 %v244_v47, %v290_v30  ;;  %vm86_vm3 = vcmp.lt.s32.totalorder %v292_v32, 3  ;;  %vm85_vm4 = vcmp.lt.s32.totalorder %v292_v32, 2  ;;  %v68_v28 = vshrl.u32 %v239_v33, %v290_v30 }
  0x98   :  { %v71_v49 = vor.u32 %v70_v37, %v69_v34  ;;  %v74_v50 = vor.u32 %v73_v39, %v72_v36  ;;  %v77_v51 = vor.u32 %v76_v42, %v75_v40  ;;  %v80_v52 = vor.u32 %v79_v45, %v78_v43 }
  0x99   :  { %v83_v53 = vor.u32 %v82_v48, %v81_v46 }
  0x9a   :  { %v92_v55 = vsel %vm84_vm1, %v71_v49, %v74_v50  ;;  %v96_v56 = vsel %vm84_vm1, %v74_v50, %v77_v51  ;;  %v93_v57 = vsel %vm87_vm2, %v80_v52, 920167782  ;;  %v89_v24 = vsel %vm87_vm2, %v77_v51, 2102212464 }
  0x9b   :  { %v97_v58 = vsel %vm87_vm2, %v83_v53, 1326507024  ;;  %v94_v59 = vsel %vm86_vm3, %v77_v51, %v93_v57  ;;  %v88_v37 = vsel %vm84_vm1, %v68_v28, %v71_v49  ;;  %v90_v38 = vsel %vm86_vm3, %v74_v50, %v89_v24 }
  0x9c   :  { %v98_v60 = vsel %vm86_vm3, %v80_v52, %v97_v58  ;;  %v95_v61 = vsel %vm85_vm4, %v92_v55, %v94_v59  ;;  %v91_v30 = vsel %vm85_vm4, %v88_v37, %v90_v38  ;;  %vm195_vm1 = vweird.f32 %v284_v21 }
  0x9d   :  { %v99_v62 = vsel %vm85_vm4, %v96_v56, %v98_v60  ;;  %v125_v4 = vand.u32 65535, %v95_v61  ;;  %v126_v5 = vshrl.u32 %v95_v61, 16  ;;  %v145_v45 = vmul.u32 %v301_v54, %v91_v30 }
  0x9e   :  { %v103_v2 = vand.u32 65535, %v99_v62  ;;  %v104_v3 = vshrl.u32 %v99_v62, 16 }
  0x9f   :  { %v128_v8 = vmul.u32 %v126_v5, %v101_v63  ;;  %v129_v9 = vmul.u32 %v125_v4, %v102_v1  ;;  %v127_v13 = vmul.u32 %v125_v4, %v101_v63  ;;  %v130_v17 = vmul.u32 %v126_v5, %v102_v1 }
  0xa0   :  { %v106_v6 = vmul.u32 %v104_v3, %v101_v63  ;;  %v107_v7 = vmul.u32 %v103_v2, %v102_v1  ;;  %v105_v10 = vmul.u32 %v103_v2, %v101_v63  ;;  %v108_v12 = vmul.u32 %v104_v3, %v102_v1 }
  0xa1   :  { %v131_v14 = vshll.u32 %v128_v8, 16  ;;  %v133_v19 = vshll.u32 %v129_v9, 16  ;;  %v132_v35 = vshrl.u32 %v128_v8, 16  ;;  %v134_v41 = vshrl.u32 %v129_v9, 16 }
  0xa2   :  { %v109_v11 = vshll.u32 %v106_v6, 16  ;;  %v111_v15 = vshll.u32 %v107_v7, 16  ;;  %v110_v29 = vshrl.u32 %v106_v6, 16  ;;  %v112_v39 = vshrl.u32 %v107_v7, 16 }
  0xa3   :  { %vm135_vm6 = vc.u32 %v127_v13, %v131_v14  ;;  %v137_v20 = vadd.s32 %v131_v14, %v127_v13 }
  0xa4   :  { %vm113_vm5 = vc.u32 %v105_v10, %v109_v11  ;;  %v115_v16 = vadd.s32 %v109_v11, %v105_v10  ;;  %v136_v23 = vsel %vm135_vm6, 1, %v235_v0 }
  0xa5   :  { %v114_v18 = vsel %vm113_vm5, 1, %v235_v0  ;;  %v138_v27 = vadd.s32 %v136_v23, %v130_v17  ;;  %vm139_vm8 = vc.u32 %v137_v20, %v133_v19  ;;  %v141_v44 = vadd.s32 %v137_v20, %v133_v19 }
  0xa6   :  { %v116_v22 = vadd.s32 %v114_v18, %v108_v12  ;;  %vm117_vm7 = vc.u32 %v115_v16, %v111_v15  ;;  %v140_v34 = vsel %vm139_vm8, 1, %v235_v0 }
  0xa7   :  { %v118_v26 = vsel %vm117_vm7, 1, %v235_v0  ;;  %v142_v36 = vadd.s32 %v140_v34, %v138_v27 }
  0xa8   :  { %v120_v31 = vadd.s32 %v118_v26, %v116_v22 }
  0xa9   :  { %v143_v42 = vadd.s32 %v142_v36, %v132_v35 }
  0xaa   :  { %v121_v40 = vadd.s32 %v120_v31, %v110_v29 }
  0xab   :  { %v144_v33 = vadd.s32 %v143_v42, %v134_v41 }
  0xac   :  { %v122_v43 = vadd.s32 %v121_v40, %v112_v39 }
  0xad   :  { %v148_v0 = vadd.s32 1, %v144_v33 }
  0xae   :  { %vm147_vm9 = vc.u32 %v122_v43, %v141_v44  ;;  %v146_v32 = vadd.s32 %v141_v44, %v122_v43 }
  0xaf   :  { %v149_v46 = vsel %vm147_vm9, %v148_v0, %v144_v33 }
  0xb0   :  { %v150_v47 = vadd.s32 %v149_v46, %v145_v45 }
  0xb2   :  { %v151_v48 = vadd.s32 536870912, %v150_v47 }
  0xb4   :  { %v152_v49 = vshrl.u32 %v151_v48, 30 }
  0xb6   :  { %v153_v51 = vshll.u32 %v152_v49, 30  ;;  %v176_v7 = vsub.s32 4, %v152_v49 }
  0xb8   :  { %v154_v50 = vsub.s32 %v150_v47, %v153_v51  ;;  %v177_v12 = vsel %vm54_vm12, %v176_v7, %v152_v49 }
  0xb9   :  { %v179_v15 = vsel %vm53_vm13, 0, %v177_v12 }
  0xba   :  { %vm155_vm10 = vcmp.lt.s32.totalorder %v154_v50, 0  ;;  %v156_v52 = vsub.s32 0, %v154_v50  ;;  %v196_v20 = vadd.s32 3, %v179_v15 }
  0xbc   :  { %v157_v53 = vsel %vm155_vm10, %v156_v52, %v154_v50  ;;  %v197_v26 = vand.u32 3, %v196_v20 }
  0xbd   :  { %v158_v55 = vclz %v157_v53 }
  0xbe   :  { %vm199_vm14 = vcmp.eq.s32.totalorder %v197_v26, 0  ;;  %vm202_vm15 = vcmp.eq.s32.totalorder %v197_v26, 2  ;;  %vm198_vm0 = vcmp.lt.s32.totalorder %v197_v26, 2 }
  0xbf   :  { %v213_v56 = vadd.s32 4294967294, %v158_v55 }
  0xc1   :  { %vm214_vm11 = vcmp.lt.s32.totalorder %v213_v56, 0 }
  0xc2   :  { %v161_v57 = vsel %vm214_vm11, 0, %v213_v56 }
  0xc3   :  { %v162_v58 = vsub.s32 32, %v161_v57  ;;  %v166_v59 = vsub.s32 4294967266, %v161_v57  ;;  %v163_v60 = vshll.u32 %v154_v50, %v161_v57 }
  0xc5   :  { %v164_v61 = vshrl.u32 %v146_v32, %v162_v58  ;;  %v167_v62 = vadd.s32 127, %v166_v59 }
  0xc7   :  { %v165_v54 = vor.u32 %v164_v61, %v163_v60  ;;  %v168_v63 = vshll.u32 %v167_v62, 23 }
  0xc9   :  { %v169_v1 = vor.u32 4788187, %v168_v63  ;;  %v172_v3 = vcvt.s32.f32 %v165_v54 }
  0xcb   :  { %v170_v2 = vand.u32 2147483647, %v169_v1 }
  0xcd   :  { %v173_v4 = vmul.f32 %v172_v3, %v170_v2 }
  0xcf   :  { %v174_v5 = vxor.u32 2147483648, %v173_v4 }
  0xd1   :  { %v175_v6 = vsel %vm54_vm12, %v174_v5, %v173_v4 }
  0xd2   :  { %v178_v8 = vsel %vm53_vm13, %v284_v21, %v175_v6 }
  0xd3   :  { %v180_v9 = vmul.f32 %v178_v8, %v178_v8 }
  0xd5   :  { %v181_v10 = vmul.f32 -0.001358992, %v180_v9  ;;  %v188_v11 = vmul.f32 -0.00019511016, %v180_v9 }
  0xd7   :  { %v182_v13 = vadd.f32 0.041655596, %v181_v10  ;;  %v189_v14 = vadd.f32 0.008332121, %v188_v11 }
  0xd9   :  { %v183_v16 = vmul.f32 %v182_v13, %v180_v9  ;;  %v190_v17 = vmul.f32 %v189_v14, %v180_v9 }
  0xdb   :  { %v184_v18 = vadd.f32 -0.4999988, %v183_v16  ;;  %v191_v19 = vadd.f32 -0.16666654, %v190_v17 }
  0xdd   :  { %v185_v22 = vmul.f32 %v184_v18, %v180_v9  ;;  %v192_v23 = vmul.f32 %v191_v19, %v180_v9 }
  0xdf   :  { %v186_v24 = vadd.f32 1.0, %v185_v22  ;;  %v193_v25 = vadd.f32 1.0, %v192_v23 }
  0xe1   :  { %v194_v27 = vmul.f32 %v193_v25, %v178_v8  ;;  %v203_v28 = vxor.u32 2147483648, %v186_v24 }
  0xe3   :  { %v200_v29 = vxor.u32 2147483648, %v194_v27  ;;  %v204_v34 = vsel %vm202_vm15, %v203_v28, %v194_v27 }
  0xe5   :  { %v201_v31 = vsel %vm199_vm14, %v186_v24, %v200_v29 }
  0xe6   :  { %v205_v35 = vsel %vm198_vm0, %v201_v31, %v204_v34 }
  0xe7   :  { %v206_v36 = vsel %vm195_vm1, nan, %v205_v35 }
  0xe8   :  { %207 = vst [vmem:[%s350_s3] sm:$0xf] %v206_v36 }

</bundles_post_ra>
